<compile_context>
chip_gen: v7x
topology: tpu7x:2x2x1
jax: 0.10.0
libtpu: 0.0.40
codegen_flags: <defaults>
</compile_context>

<pallas_src>
import functools

import jax
import jax.numpy as jnp
from jax.experimental import pallas as pl
from jax.experimental.pallas import tpu as pltpu


# --------------------------------------------------------------------------
# Small helpers (trace-time Python).
# --------------------------------------------------------------------------
def _ceil_to(v, m):
    return -(-v // m) * m


def _divisors(v):
    ds = set()
    i = 1
    while i * i <= v:
        if v % i == 0:
            ds.add(i)
            ds.add(v // i)
        i += 1
    return ds


@functools.lru_cache(maxsize=None)
def _vmem_limit_bytes():
    """Generation-aware scoped-VMEM limit (~3/4 of physical VMEM)."""
    cap = 64 * 1024 * 1024
    try:
        cap = int(pltpu.get_tpu_info().vmem_capacity_bytes)
    except Exception:
        pass
    return max(32 * 1024 * 1024, (cap * 3) // 4)


def _choose_row_block(rows, lane_in, lane_out, itemsize, vmem_limit):
    """Largest legal merged-row block whose double-buffered in/out blocks plus
    in-kernel temporaries fit the scoped-VMEM limit."""
    sub = max(8, 32 // max(1, itemsize))          # sublane tile: 8 f32 / 16 bf16
    cands = sorted((d for d in _divisors(rows) if d % sub == 0 or d == rows),
                   reverse=True)
    pin = _ceil_to(lane_in, 128) * itemsize       # lane-padded bytes per row (in)
    pout = _ceil_to(lane_out, 128) * itemsize     # lane-padded bytes per row (out)

    def fits(d):
        prow = _ceil_to(d, sub)
        # 2x double-buffered input + 2x output + ~3x input-sized temporaries.
        return prow * (5 * pin + 2 * pout) <= vmem_limit

    fitting = [d for d in cands if fits(d)]
    if not fitting:
        return min(cands)
    multi = [d for d in fitting if rows // d >= 2]   # keep >=2 steps pipelined
    return multi[0] if multi else fitting[0]


def _decimation_matrix(n_in, n_out, stride, dtype, left=False):
    """Exact 0/1 selection matrix picking every `stride`-th element."""
    if left:   # (n_out, n_in), S[o, i] = 1 where i == o*stride
        oi = jax.lax.broadcasted_iota(jnp.int32, (n_out, n_in), 0)
        ii = jax.lax.broadcasted_iota(jnp.int32, (n_out, n_in), 1)
        return (ii == oi * stride).astype(dtype)
    ii = jax.lax.broadcasted_iota(jnp.int32, (n_in, n_out), 0)
    oi = jax.lax.broadcasted_iota(jnp.int32, (n_in, n_out), 1)
    return (ii == oi * stride).astype(dtype)


# --------------------------------------------------------------------------
# Fast path: kernel_size == stride (the VGG 2x2/2 case), merged-row layout.
# --------------------------------------------------------------------------
def _pool_stride_eq_kernel(x_ref, o_ref, *, k, w, ow):
    """x_ref: (1, R, k*w) merged rows; o_ref: (1, R, ow)."""
    used = ow * k                                   # floor-mode trimmed width
    # Height taps: the k input rows of each output row sit side by side on the
    # lane axis, so every tap is a static unit-stride lane slice of the ref.
    hm = x_ref[0, :, 0:used]
    for kh in range(1, k):
        hm = jnp.maximum(hm, x_ref[0, :, kh * w:kh * w + used])
    # Width taps: sliding max via unit-stride lane slices (VPU maxima).
    lw = used - (k - 1)
    m = hm[:, 0:lw]
    for kw in range(1, k):
        m = jnp.maximum(m, hm[:, kw:kw + lw])
    # Keep every k-th lane with an exact 0/1 selection matmul (MXU, f32 acc).
    if not jnp.issubdtype(m.dtype, jnp.floating):
        m = m.astype(jnp.float32)  # TODO(synk): exact only for |x| < 2**24 ints
    sel = _decimation_matrix(lw, ow, k, m.dtype)
    out = jax.lax.dot_general(m, sel, (((1,), (0,)), ((), ())),
                              preferred_element_type=jnp.float32)
    o_ref[0] = out.astype(o_ref.dtype)


def _pool_stride_eq(x, k, oh, ow, vmem_limit):
    n, c, h, w = x.shape
    if oh * k != h:
        x = x[:, :, :oh * k, :]                     # rare odd-H floor trim
    xr = x.reshape(n, c * oh, k * w)                # free row-major reshape
    rows = c * oh
    rblk = _choose_row_block(rows, k * w, ow, x.dtype.itemsize, vmem_limit)
    kern = functools.partial(_pool_stride_eq_kernel, k=k, w=w, ow=ow)
    out = pl.pallas_call(
        kern,
        out_shape=jax.ShapeDtypeStruct((n, rows, ow), x.dtype),
        grid=(n, rows // rblk),
        in_specs=[pl.BlockSpec((1, rblk, k * w), lambda i, j: (i, j, 0))],
        out_specs=pl.BlockSpec((1, rblk, ow), lambda i, j: (i, j, 0)),
        compiler_params=pltpu.CompilerParams(
            dimension_semantics=("parallel", "parallel"),
            vmem_limit_bytes=vmem_limit),
    )(xr)
    return out.reshape(n, c, oh, ow)


# --------------------------------------------------------------------------
# General fallback: kernel_size != stride (not used by VGG16).
# --------------------------------------------------------------------------
def _pool_general_kernel(x_ref, o_ref, *, k, s, oh, ow):
    """x_ref: (1, 1, H, W); o_ref: (1, 1, OH, OW). One channel plane per step."""
    lw = (ow - 1) * s + 1
    lh = (oh - 1) * s + 1
    he = lh + (k - 1)                               # used input rows
    # Width taps: sliding max via unit-stride lane slices of the ref.
    m = x_ref[0, 0, 0:he, 0:lw]
    for kw in range(1, k):
        m = jnp.maximum(m, x_ref[0, 0, 0:he, kw:kw + lw])
    if not jnp.issubdtype(m.dtype, jnp.floating):
        m = m.astype(jnp.float32)
    sel_w = _decimation_matrix(lw, ow, s, m.dtype)
    y = jax.lax.dot_general(m, sel_w, (((1,), (0,)), ((), ())),
                            preferred_element_type=jnp.float32)   # (he, ow) f32
    # Height taps: sliding max via unit-stride sublane slices.
    m2 = y[0:lh, :]
    for kh in range(1, k):
        m2 = jnp.maximum(m2, y[kh:kh + lh, :])
    sel_h = _decimation_matrix(lh, oh, s, m2.dtype, left=True)     # (oh, lh)
    out = jax.lax.dot_general(sel_h, m2, (((1,), (0,)), ((), ())),
                              preferred_element_type=jnp.float32)  # (oh, ow)
    o_ref[0, 0] = out.astype(o_ref.dtype)


def _pool_general(x, k, s, oh, ow, vmem_limit):
    n, c, h, w = x.shape
    kern = functools.partial(_pool_general_kernel, k=k, s=s, oh=oh, ow=ow)
    return pl.pallas_call(
        kern,
        out_shape=jax.ShapeDtypeStruct((n, c, oh, ow), x.dtype),
        grid=(n, c),
        in_specs=[pl.BlockSpec((1, 1, h, w), lambda i, j: (i, j, 0, 0))],
        out_specs=pl.BlockSpec((1, 1, oh, ow), lambda i, j: (i, j, 0, 0)),
        compiler_params=pltpu.CompilerParams(
            dimension_semantics=("parallel", "parallel"),
            vmem_limit_bytes=vmem_limit),
    )(x)


# --------------------------------------------------------------------------
# Public entry points.
# --------------------------------------------------------------------------
def max_pool2d_nchw(x, kernel_size, stride):
    """MaxPool2d (no padding, dilation=1, floor mode) on NCHW (or CHW) input."""
    k, s = int(kernel_size), int(stride)
    added_batch = (x.ndim == 3)
    if added_batch:
        x = x[None]
    n, c, h, w = x.shape
    oh = (h - k) // s + 1
    ow = (w - k) // s + 1
    vmem_limit = _vmem_limit_bytes()
    if k == 1 and s == 1:
        out = x
    elif k == s:
        out = _pool_stride_eq(x, k, oh, ow, vmem_limit)
    else:
        out = _pool_general(x, k, s, oh, ow, vmem_limit)
    return out[0] if added_batch else out


class PoolIfPossible:
    """JAX/Pallas port of the PyTorch module (MaxPool2d has no parameters)."""

    def __init__(self, kernel_size, stride):
        self.kernel_size = int(kernel_size)
        self.stride = int(stride)

    def __call__(self, x):
        # torch: `x.squeeze().ndim == x.ndim`  <=>  no size-1 dims.
        # Shapes are static in JAX, so this is a trace-time Python branch.
        if any(d == 1 for d in x.shape):
            return x
        return max_pool2d_nchw(x, self.kernel_size, self.stride)


if __name__ == "__main__":
    k0, k1, k2, k3 = jax.random.split(jax.random.PRNGKey(0), 4)
    module = PoolIfPossible(kernel_size=2, stride=2)

    # 1) Small NCHW input consistent with the module's use inside VGG16.
    x = jax.random.normal(k0, (2, 4, 16, 16), dtype=jnp.float32)
    y = jax.block_until_ready(module(x))
    assert y.shape == (2, 4, 8, 8), y.shape
    ref = x.reshape(2, 4, 8, 2, 8, 2).max(axis=(3, 5))
    assert jnp.array_equal(y, ref), "max-pool mismatch vs reference (C=4)"

    # 2) Wider channel count (checks the row-block tiler at larger sizes).
    xc = jax.random.normal(k1, (2, 128, 16, 16), dtype=jnp.float32)
    yc = jax.block_until_ready(module(xc))
    refc = xc.reshape(2, 128, 8, 2, 8, 2).max(axis=(3, 5))
    assert yc.shape == (2, 128, 8, 8) and jnp.array_equal(yc, refc)

    # 3) Floor mode: odd spatial size drops the trailing row/column.
    xo = jax.random.normal(k2, (2, 4, 17, 17), dtype=jnp.float32)
    yo = jax.block_until_ready(module(xo))
    refo = xo[:, :, :16, :16].reshape(2, 4, 8, 2, 8, 2).max(axis=(3, 5))
    assert yo.shape == (2, 4, 8, 8) and jnp.array_equal(yo, refo)

    # 4) bf16 activations (maxima and 0/1 selection matmul are exact).
    xb = jax.random.normal(k3, (2, 8, 16, 16), dtype=jnp.bfloat16)
    yb = jax.block_until_ready(module(xb))
    refb = xb.reshape(2, 8, 8, 2, 8, 2).max(axis=(3, 5))
    assert yb.shape == (2, 8, 8, 8) and jnp.array_equal(yb, refb)

    # 5) Pass-through branch: any size-1 dim means squeeze() changes ndim.
    x1 = jax.random.normal(k0, (1, 4, 16, 16), dtype=jnp.float32)
    y1 = jax.block_until_ready(module(x1))
    assert y1.shape == x1.shape and jnp.array_equal(y1, x1)

    print("KERNEL_OK")
</pallas_src>

<mosaic_0001>
module attributes {stable_mosaic.version = 11 : i64} {
  func.func @_pool_stride_eq_kernel(%arg0: i32, %arg1: i32, %arg2: memref<1x16x32xf32, #tpu.memory_space<vmem>>, %arg3: memref<1x16x8xf32, #tpu.memory_space<vmem>>) attributes {dimension_semantics = [#tpu.dimension_semantics<parallel>, #tpu.dimension_semantics<parallel>], iteration_bounds = array<i64: 2, 2>, scalar_prefetch = 0 : i64, scratch_operands = 0 : i64, tpu.core_type = #tpu.core_type<tc>, window_params = [{transform_indices = @transform_0, window_bounds = array<i64: 1, 16, 32>}, {transform_indices = @transform_1, window_bounds = array<i64: 1, 16, 8>}]} {
    %c0 = arith.constant 0 : index
    %c0_0 = arith.constant 0 : index
    %c0_1 = arith.constant 0 : index
    %0 = vector.load %arg2[%c0, %c0_0, %c0_1] : memref<1x16x32xf32, #tpu.memory_space<vmem>>, vector<1x16x16xf32>
    %1 = vector.shape_cast %0 : vector<1x16x16xf32> to vector<16x16xf32>
    %c0_2 = arith.constant 0 : index
    %c0_3 = arith.constant 0 : index
    %c16 = arith.constant 16 : index
    %2 = vector.load %arg2[%c0_2, %c0_3, %c16] : memref<1x16x32xf32, #tpu.memory_space<vmem>>, vector<1x16x16xf32>
    %3 = vector.shape_cast %2 : vector<1x16x16xf32> to vector<16x16xf32>
    %4 = arith.maximumf %1, %3 : vector<16x16xf32>
    %5 = vector.extract_strided_slice %4 {offsets = [0, 0], sizes = [16, 15], strides = [1, 1]} : vector<16x16xf32> to vector<16x15xf32>
    %6 = vector.extract_strided_slice %4 {offsets = [0, 1], sizes = [16, 15], strides = [1, 1]} : vector<16x16xf32> to vector<16x15xf32>
    %7 = arith.maximumf %5, %6 : vector<16x15xf32>
    %8 = tpu.iota {dimensions = array<i32: 0>} : vector<15x8xi32>
    %9 = tpu.iota {dimensions = array<i32: 1>} : vector<15x8xi32>
    %c2_i32 = arith.constant 2 : i32
    %10 = vector.broadcast %c2_i32 : i32 to vector<15x8xi32>
    %11 = arith.muli %9, %10 : vector<15x8xi32>
    %12 = arith.cmpi eq, %8, %11 : vector<15x8xi32>
    %13 = arith.extui %12 : vector<15x8xi1> to vector<15x8xi32>
    %14 = arith.sitofp %13 : vector<15x8xi32> to vector<15x8xf32>
    %cst = arith.constant dense<0.000000e+00> : vector<16x8xf32>
    %15 = tpu.matmul %7, %14, %cst {dimension_numbers = #tpu.dot_dimension_numbers<[1], [0], [0], [1], [0, 0, 1, 1], [], []>} : vector<16x15xf32>, vector<15x8xf32>, vector<16x8xf32> -> vector<16x8xf32>
    %c0_4 = arith.constant 0 : index
    %c0_5 = arith.constant 0 : index
    %c0_6 = arith.constant 0 : index
    %16 = vector.load %arg3[%c0_4, %c0_5, %c0_6] : memref<1x16x8xf32, #tpu.memory_space<vmem>>, vector<1x16x8xf32>
    %17 = vector.shape_cast %16 : vector<1x16x8xf32> to vector<16x8xf32>
    %18 = vector.shape_cast %15 : vector<16x8xf32> to vector<1x16x8xf32>
    tpu.vector_store %arg3[%c0_4, %c0_5, %c0_6], %18 {strides = array<i32>} : memref<1x16x8xf32, #tpu.memory_space<vmem>>, vector<1x16x8xf32>,
    return
  }
  func.func @transform_0(%arg0: i32, %arg1: i32) -> (i32, i32, i32) {
    %c0_i32 = arith.constant 0 : i32
    %c0_i32_0 = arith.constant 0 : i32
    return %arg0, %arg1, %c0_i32 : i32, i32, i32
  }
  func.func @transform_1(%arg0: i32, %arg1: i32) -> (i32, i32, i32) {
    %c0_i32 = arith.constant 0 : i32
    %c0_i32_0 = arith.constant 0 : i32
    return %arg0, %arg1, %c0_i32 : i32, i32, i32
  }
}

</mosaic_0001>

<bundles_post_ra>
// kernel: tpu_custom_call.1
= control target key start
LH: loop header
LB: loop body
LE: loop exit
PB: predicated region body
PF: predicated region fallthrough
CT: control target
= control target key end

     0   :  { %6 = vsyncpa [#allocation3], 0  ;;  %s768_s0 = inlined_call_operand.hbm [shape: f32[2,32,32], index: 0, kind: input, shape index: {}]   ;;  %s769_s1 = inlined_call_operand.vmem [shape: f32[2,32,8], index: 1, kind: output, shape index: {}]  }
   0x1   :  { %8 = vsyncpa [#allocation3 + $0x1], 0  ;;  %s616_s6 = smov 0   ;;  %s618_s7 = smov 0  }
   0x2   :  { %s620_s8 = smov 0   ;;  %s622_s9 = smov 0  }
   0x3   :  { %s624_s10 = smov 0   ;;  %s626_s11 = smov 0  }
   0x4   :  { %s628_s12 = smov 0   ;;  %s630_s13 = smov 0  }
   0x5 LB: > { %s386_s14 = sadd.s32 4294967295, %s597_s13   ;;  %s23_s15 = sadd.s32 1, %s589_s11  ;;  %s597_s13 = sphi %s630_s13, %s14_s13   ;;  %s593_s12 = sphi %s628_s12, %s780_s12   ;;  %s589_s11 = sphi %s626_s11, %s779_s11   ;;  %s585_s10 = sphi %s624_s10, %s778_s10   ;;  %s581_s9 = sphi %s622_s9, %s777_s9   ;;  %s577_s8 = sphi %s620_s8, %s776_s8   ;;  %s573_s7 = sphi %s618_s7, %s775_s7   ;;  %s569_s6 = sphi %s616_s6, %s774_s6  }
   0x6   : > { %p24_p0 = scmp.ge.s32.totalorder %s23_s15, 2  ;;  %s26_s16 = sadd.s32 1, %s593_s12 }
   0x7   : > { %s35_s17 = sadd.s32 1, %s577_s8  ;;  %p42_p1 = scmp.ne.s32.totalorder %s577_s8, %s573_s7 }
   0x8   : > { %s782_s15 = smov (%p24_p0, %s23_s15), 0  ;;  %s784_s16 = smov (!%p24_p0, %s26_s16), %s593_s12 }
   0x9   : > { %s31_s18 = ssub.s32 %s589_s11, %s782_s15  ;;  %p43_p2 = scmp.eq.s32.totalorder %s597_s13, 0 }
   0xa   : > { %p28_p3 = scmp.ge.s32.totalorder %s784_s16, 2  ;;  %p48_p4 = scmp.ne.s32.totalorder %s573_s7, %s569_s6 }
   0xb   : > { %p667_p5 = por %p43_p2, %p42_p1  ;;  %p49_p6 = scmp.eq.s32.totalorder %s386_s14, 0 }
   0xc   : > { %s786_s16 = smov (%p28_p3, %s784_s16), 0  ;;  %p430_p8 = scmp.lt.s32.totalorder %s597_s13, 4 }
   0xd   : > { %p673_p7 = por %p49_p6, %p48_p4  ;;  %s30_s21 = ssub.s32 %s593_s12, %s786_s16 }
   0xe   : > { %s32_s22 = sor.u32 %s31_s18, %s30_s21  ;;  %s100_s23 = sand.u32 1, %s577_s8  }
   0xf   : > { %p33_p9 = scmp.eq.s32.totalorder %s32_s22, 0  ;;  %s390_s24 = sshll.u32 %s100_s23, 4 }
  0x10   : > { %s391_s25 = sshll.u32 %s589_s11, 1  ;;  %s392_s27 = sshll.u32 %s593_s12, 2 }
  0x11   : > { %s683_s26 = scalar_select %p33_p9, %s577_s8, %s35_s17  }
  0x12   : > { %s110_s28 = sadd.s32 %s392_s27, %s391_s25  ;;  %s104_s29 = scalar_lea.vmem [#allocation2], %s390_s24 }
  0x13   : > { %s113_s30 = sshll.u32 %s104_s29, 4  ;;  %s393_s2 = sshll.u32 %s110_s28, 7  ;;  %s686_s30 = int_to_ptr.vmem [resolvable:$true] %s113_s30 }
  0x14   : > { %s691_s5 = scalar_lea.hbm %s768_s0, %s393_s2  ;;  %p697_p10 = pnand %p430_p8, %p667_p5 }
  0x15   : > { %s702_s14 = scalar_lea.sflag [#allocation3], %s100_s23  ;;  %s501_s17 = scalar_lea.hbm %s691_s5, 256 }
  0x16   : > { %p502_p12 = scmp.ne.s32.totalorder %s691_s5, %s501_s17  ;;  %p503_p13 = pneg %p697_p10 }
  0x17   : > { %s506_s21 = scalar_lea.hbm %s768_s0, 1024  ;;  %p507_p2 = scmp.lt.u32.totalorder %s691_s5, %s768_s0 }
  0x18   : > { %p504_p0 = pnand %p503_p13, %p502_p12  ;;  %p508_p3 = scmp.lt.u32.totalorder %s506_s21, %s501_s17 }
  0x19   : > { %p510_p5 = scmp.lt.u32.totalorder %s501_s17, %s691_s5 }
  0x1a   : > { %p505_p1 = pneg %p504_p0  ;;  %p509_p4 = por %p508_p3, %p507_p2 }
  0x1c   : > { %p511_p6 = por %p510_p5, %p509_p4 }
  0x1e   : > { %p512_p8 = pnand %p511_p6, %p505_p1 }
  0x20   : > { %515 = shalt.err (!%p512_p8)
}
  0x21   : > { %s516_s23 = scalar_lea.vmem %s686_s30, 256  ;;  %s599_s25 = smov [#allocation2]  }
  0x22   : > { %p517_p9 = scmp.ne.s32.totalorder %s686_s30, %s516_s23  ;;  %s521_s27 = sshll.u32 %s599_s25, 4  ;;  %s522_s27 = int_to_ptr.vmem [resolvable:$false] %s521_s27 }
  0x23   : > { %s523_s28 = scalar_lea.vmem %s522_s27, 512  ;;  %p524_p11 = scmp.lt.s32.totalorder %s686_s30, %s522_s27 }
  0x24   : > { %p519_p12 = pnand %p517_p9, %p503_p13  ;;  %p525_p2 = scmp.lt.s32.totalorder %s523_s28, %s516_s23 }
  0x26   : > { %p520_p0 = pneg %p519_p12  ;;  %p526_p3 = por %p525_p2, %p524_p11 }
  0x28   : > { %p527_p4 = pnand %p526_p3, %p520_p0 }
  0x2a   : > { %530 = shalt.err (!%p527_p4)
}
  0x2b   : > { %s600_s29 = smov 128   ;;  %s601_s2 = smov 8  }
  0x2c   : > { %429 = dma.hbm_to_vmem [thread:$0]  (!%p697_p10), %s691_s5, 256, %s686_s30, %s702_s14, %s600_s29, %s600_s29, %s601_s2  }
  0x2d   : > { %p121_p13 = scmp.lt.s32.totalorder %s597_s13, 5  ;;  %p773_p1 = scmp.ge.s32.totalorder %s597_s13, 1 }
  0x2f   : > { %p122_p5 = pnand %p773_p1, %p121_p13 }
  0x30   : > { %s127_s3 = sand.u32 (!%p122_p5), 1, %s573_s7  }
  0x31   : > { %125 = sbr.rel (%p122_p5) target bundleno = 510 (0x1fe), region = 24  ;;  %s395_s4 = sshll.u32 (!%p122_p5), %s127_s3, 4 }
  0x32   : > { %s128_s17 = scalar_lea.sflag (!%p122_p5), [#allocation3], %s127_s3  ;;  %s131_s18 = scalar_lea.vmem (!%p122_p5), [#allocation2], %s395_s4 }
  0x38   : > { %564 = dma.done.wait (%p673_p7), %s128_s17, 256  }
  0x39   : > { %566 = vsyncadd (%p673_p7), %s128_s17, 4294967040  ;;  %v165_v0 = vld [vmem:[%s131_s18] sm:$0xff]  ;;  %s602_s19 = smov 112   ;;  %v166_v1 = vld [vmem:[%s131_s18 + $0x8] sm:$0xff]  ;;  %v187_v2 = vlaneseq  ;;  %v603_v7 = vmov 0.0   ;;  %vm206_vm2 = vcmask 1046528  }
  0x3a   : > { %169 = vrot.lane.b32.xlu0 %v165_v0, %s602_s19  ;;  %v604_v9 = vmov 1.0   ;;  %s605_s20 = smov 127   ;;  %vm199_vm4 = vcmask 121856   ;;  %s396_s30 = sshll.u32 %s581_s9, 1  ;;  %vm285_vm5 = vcmask 64512  }
  0x3b   : > { %v188_v3 = vshrl.u32 %v187_v2, 7  ;;  %v191_v4 = vand.u32 127, %v187_v2  ;;  %p156_p7 = scmp.lt.s32.totalorder %s585_s10, 1  ;;  %p158_p10 = scmp.lt.s32.totalorder %s396_s30, 3 }
  0x3d   : > { %v189_v5 = vadd.s32 8, %v188_v3  ;;  %v192_v6 = vmul.u32 2, %v191_v4  ;;  %s788_s10 = smov (!%p156_p7, %s585_s10), 1  ;;  %s790_s30 = smov (!%p158_p10, %s396_s30), 3 }
  0x3e   : > { %171 = vrot.lane.b32.xlu0 %v166_v1, %s602_s19  ;;  %s397_s5 = sshll.u32 %s788_s10, 2 }
  0x3f   : > { %vm194_vm0 = vcmp.eq.s32.totalorder %v189_v5, %v192_v6  ;;  %vm193_vm1 = vcmp.eq.s32.totalorder %v188_v3, %v192_v6  ;;  %s161_s6 = sadd.s32 %s397_s5, %s790_s30 }
  0x40   : > { %v400_v8 = vsel %vm194_vm0, 1.0, %v603_v7  ;;  %vm419_vm3 = vmpackc.low %vm206_vm2, %vm193_vm1  ;;  %s398_s14 = sshll.u32 %s161_s6, 3 }
  0x41   : > { %v418_v10 = vpack.c.bf16 %v400_v8, %v604_v9  ;;  %s163_s24 = scalar_lea.vmem %s769_s1, %s398_s14 }
  0x43   : > { %420 = vmatprep.subr.msk.bf16.mxu0 %vm419_vm3, %v418_v10 }
  0x44   : > { %423 = vmatpush3.bf16.msk.msra.mxu0 %vm419_vm3, %v418_v10 }
  0xac   : > { %v170_v11 = vpop.permute.xlu0 %169 }
  0xad   : > { %v175_v12 = vmax.f32 %v165_v0, %v170_v11 }
  0xaf   : > { %179 = vrot.lane.b32.xlu1 %v175_v12, %s605_s20 }
  0xb0   : > { %v172_v13 = vpop.permute.xlu0 %171 }
  0xb1   : > { %v176_v14 = vmax.f32 %v166_v1, %v172_v13 }
  0xb3   : > { %181 = vrot.lane.b32.xlu1 %v176_v14, %s605_s20 }
 0x121   : > { %v180_v15 = vpop.permute.xlu1 %179 }
 0x122   : > { %v185_v16 = vmax.f32 %v175_v12, %v180_v15 }
 0x124   : > { %415 = vmatprep.mubr.msk.f32.mxu0 %vm199_vm4, %v185_v16 }
 0x125   : > { %v182_v17 = vpop.permute.xlu1 %181 }
 0x126   : > { %v186_v18 = vmax.f32 %v176_v14, %v182_v17 }
 0x128   : > { %416 = vmatmul.mubr.msk.f32.vlgmr.msra.gmra.mrb[0].mxu0 %vm199_vm4, %v186_v18 }
 0x1fb   : > { %v417_v19 = vpop.f32.mrb[0].mxu0 }
 0x1fc   : > { %287 = vst.msk [vmem:[%s163_s24 + $0x8] sm:$0xff] %vm285_vm5, %v417_v19  ;;  %v276_v20 = vpop.f32.mrb[1].mxu0 }
 0x1fd   : > { %286 = vst.msk [vmem:[%s163_s24] sm:$0xff] %vm285_vm5, %v276_v20 }
 0x1fe PF: > { %s14_s13 = sadd.s32 1, %s597_s13   ;;  %s774_s6 = smov %s573_s7 }
 0x1ff   : > { %p11_p11 = scmp.ge.s32.totalorder %s14_s13, 6   ;;  %s775_s7 = smov %s577_s8 }
 0x200   : > { %s776_s8 = smov %s683_s26  ;;  %s777_s9 = smov %s589_s11 }
 0x201   : > { %s778_s10 = smov %s593_s12  ;;  %s779_s11 = smov %s782_s15 }
 0x202   : > { %s780_s12 = smov %s786_s16  ;;  %13 = sbr.rel (!%p11_p11) target bundleno = 5 (0x5), region = 64 }
 0x209   :  { %318 = vsyncpa [#allocation3], 1 }
 0x20a   :  { %320 = vsyncpa [#allocation3 + $0x1], 1 }

</bundles_post_ra>
